<compile_context>
chip_gen: v7x
topology: tpu7x:2x2x1
jax: 0.10.0
libtpu: 0.0.40
codegen_flags: <defaults>
</compile_context>

<pallas_src>
import jax
import jax.numpy as jnp
from jax import lax
from jax.experimental import pallas as pl
from jax.experimental.pallas import tpu as pltpu

HIDDEN = 64
LANES = 128
MATMUL_DTYPE = jnp.bfloat16   # jnp.float32 recovers 1e-4 agreement with the ref


def gru_linear_kernel(x_ref, wih_ref, whh_ref, bg_ref, bhn_ref,
                      wlin_ref, blin_ref,
                      out_ref,
                      h_ref, xg_ref, hseq_ref):
    """One (batch-block, time-chunk) tile of the fused GRU + Linear forward.

    x_ref:    (Tc*R, D)  time-major rows within the chunk: row = t_local*R + b
    wih_ref:  (D, 3H)    packed [r|z|n] input->gate weights (bf16)
    whh_ref:  (H, 3H)    packed hidden->gate weights (bf16)
    bg_ref:   (1, 3H)    folded biases [b_ir+b_hr | b_iz+b_hz | b_in] (f32)
    bhn_ref:  (1, H)     b_hn (stays inside the r*(.) term) (f32)
    wlin/blin:(H, Opad)/(1, Opad) lane-dense (zero-padded to 128) head
    out_ref:  (Tc*R, Opad)
    h_ref:    (R, H)     persistent f32 hidden-state carry across time chunks
    xg_ref:   (Tc*R, 3H) scratch: packed input projection
    hseq_ref: (Tc*R, H)  scratch: hidden states of this chunk
    """
    TB, _ = x_ref.shape
    R, H = h_ref.shape
    Tc = TB // R

    # Reset the carried hidden state at the start of each sequence (chunk 0).
    @pl.when(pl.program_id(1) == 0)
    def _():
        h_ref[...] = jnp.zeros_like(h_ref)

    # Input projection for the whole chunk: one tall bf16 matmul, biases folded.
    xg_ref[...] = jnp.dot(x_ref[...].astype(MATMUL_DTYPE), wih_ref[...],
                          preferred_element_type=jnp.float32) + bg_ref[...]

    whh = whh_ref[...]                             # (H, 3H) packed [r|z|n]
    bhn = jnp.broadcast_to(bhn_ref[...], (R, H))   # hoisted loop-invariant bcast

    def step(t, h):
        off = pl.multiple_of(t * R, R)             # R is a multiple of 8
        # Single fused hidden matmul per step: one MXU push/pop instead of 3.
        g = jnp.dot(h.astype(MATMUL_DTYPE), whh,
                    preferred_element_type=jnp.float32)        # (R, 3H)
        xg = xg_ref[pl.ds(off, R), :]
        r = jax.nn.sigmoid(xg[:, :H] + g[:, :H])
        z = jax.nn.sigmoid(xg[:, H:2 * H] + g[:, H:2 * H])
        n = jnp.tanh(xg[:, 2 * H:] + r * (g[:, 2 * H:] + bhn))
        h_new = n + z * (h - n)                    # = (1-z)*n + z*h, one mul less
        hseq_ref[pl.ds(off, R), :] = h_new
        return h_new

    h_final = lax.fori_loop(0, Tc, step, h_ref[...],
                            unroll=True if Tc <= 16 else 8)
    h_ref[...] = h_final                           # carry h across time chunks

    # Output head once per chunk: (Tc*R, H) @ (H, 128) -> lane-dense single store.
    out_ref[...] = jnp.dot(hseq_ref[...].astype(MATMUL_DTYPE), wlin_ref[...],
                           preferred_element_type=jnp.float32) + blin_ref[...]


def _choose_rows(batch):
    """Rows (sequences) per program: multiple of 8, <=256, >=2 blocks if possible."""
    b8 = ((batch + 7) // 8) * 8
    if b8 <= 8:
        return 8
    half = (((b8 + 1) // 2) + 7) // 8 * 8   # aim for nb >= 2 (v7x: 2 TensorCores)
    return min(256, half)


def gru_linear_forward(x, prepared, out_dim):
    """x: (B, T, D) f32 -> (B, T, out_dim) f32 (batch_first, like the module)."""
    B, T, D = x.shape
    w_ih, w_hh, b_gates, b_hn, w_lin, b_lin = prepared
    H = w_hh.shape[0]
    Opad = w_lin.shape[1]

    R = _choose_rows(B)
    nb = -(-B // R)
    Bp = nb * R

    # Time-chunk size from an ~8 MiB VMEM budget (scratch + double-buffered
    # x/out blocks), so it fits v7x's 64 MiB VMEM and v5e's 16 MiB scoped default.
    row_bytes = 4 * (3 * H + H) + 2 * 4 * D + 2 * 4 * Opad
    budget = 8 << 20
    Tc = max(1, min(T, budget // (R * row_bytes)))
    nt = -(-T // Tc)
    Tp = nt * Tc

    xp = x
    if (Bp, Tp) != (B, T):
        xp = jnp.pad(x, ((0, Bp - B), (0, Tp - T), (0, 0)))
    # (Bp,Tp,D) -> (nb,R,Tp,D) -> (nb,Tp,R,D) -> (nb,Tp*R,D): time-major per block.
    x_blk = xp.reshape(nb, R, Tp, D).transpose(0, 2, 1, 3).reshape(nb, Tp * R, D)

    full = lambda shape: pl.BlockSpec(shape, lambda i, t: (0, 0))

    out_blk = pl.pallas_call(
        gru_linear_kernel,
        out_shape=jax.ShapeDtypeStruct((nb, Tp * R, Opad), jnp.float32),
        grid=(nb, nt),
        in_specs=[
            pl.BlockSpec((None, Tc * R, D), lambda i, t: (i, t, 0)),  # x chunk
            full((D, 3 * H)),        # W_ih packed [r|z|n]
            full((H, 3 * H)),        # W_hh packed [r|z|n]
            full((1, 3 * H)),        # folded gate biases
            full((1, H)),            # b_hn
            full((H, Opad)),         # Linear weight (lane-dense padded)
            full((1, Opad)),         # Linear bias
        ],
        out_specs=pl.BlockSpec((None, Tc * R, Opad), lambda i, t: (i, t, 0)),
        scratch_shapes=[
            pltpu.VMEM((R, H), jnp.float32),            # persistent h carry
            pltpu.VMEM((Tc * R, 3 * H), jnp.float32),   # packed input projection
            pltpu.VMEM((Tc * R, H), jnp.float32),       # h sequence of the chunk
        ],
        compiler_params=pltpu.CompilerParams(
            dimension_semantics=("parallel", "arbitrary")),
    )(x_blk, w_ih, w_hh, b_gates, b_hn, w_lin, b_lin)

    # (nb,Tp*R,Opad) -> (nb,Tp,R,Opad) -> (nb,R,Tp,Opad) -> (Bp,Tp,Opad)
    y = out_blk.reshape(nb, Tp, R, Opad).transpose(0, 2, 1, 3).reshape(Bp, Tp, Opad)
    return y[:B, :T, :out_dim]


def init_params(key, input_size, hidden_size, output_size):
    """PyTorch-convention parameters (pre-transposed to (in,out)), gate order [r,z,n]."""
    ks = jax.random.split(key, 6)
    bound = 1.0 / jnp.sqrt(hidden_size)
    w_ih = jax.random.uniform(ks[0], (input_size, 3 * hidden_size),
                              jnp.float32, -bound, bound)
    w_hh = jax.random.uniform(ks[1], (hidden_size, 3 * hidden_size),
                              jnp.float32, -bound, bound)
    b_ih = jax.random.uniform(ks[2], (1, 3 * hidden_size), jnp.float32, -bound, bound)
    b_hh = jax.random.uniform(ks[3], (1, 3 * hidden_size), jnp.float32, -bound, bound)
    w_lin = jax.random.uniform(ks[4], (hidden_size, output_size),
                               jnp.float32, -bound, bound)
    b_lin = jax.random.uniform(ks[5], (1, output_size), jnp.float32, -bound, bound)
    return (w_ih, w_hh, b_ih, b_hh, w_lin, b_lin)


def prepare_params(params):
    """Pack gates, fold biases, cast matmul operands to bf16, pad head to 128 lanes."""
    w_ih, w_hh, b_ih, b_hh, w_lin, b_lin = params
    H = w_hh.shape[0]
    O = w_lin.shape[1]
    Opad = max(LANES, ((O + LANES - 1) // LANES) * LANES)

    b_gates = jnp.concatenate(
        [b_ih[:, :H] + b_hh[:, :H],            # b_r = b_ir + b_hr
         b_ih[:, H:2 * H] + b_hh[:, H:2 * H],  # b_z = b_iz + b_hz
         b_ih[:, 2 * H:]], axis=1)             # b_in (input half of n gate)
    b_hn = b_hh[:, 2 * H:]                     # stays inside r*(.)

    w_lin_p = jnp.pad(w_lin, ((0, 0), (0, Opad - O)))
    b_lin_p = jnp.pad(b_lin, ((0, 0), (0, Opad - O)))

    return (w_ih.astype(MATMUL_DTYPE), w_hh.astype(MATMUL_DTYPE),
            b_gates, b_hn,
            w_lin_p.astype(MATMUL_DTYPE), b_lin_p)


def reference_forward(x, params):
    """Pure-JAX f32 reference of the PyTorch GRU + Linear forward."""
    w_ih, w_hh, b_ih, b_hh, w_lin, b_lin = params
    B, T, D = x.shape
    H = w_hh.shape[0]
    h = jnp.zeros((B, H), jnp.float32)
    outs = []
    for t in range(T):
        gx = x[:, t, :] @ w_ih + b_ih
        gh = h @ w_hh + b_hh
        r = jax.nn.sigmoid(gx[:, :H] + gh[:, :H])
        z = jax.nn.sigmoid(gx[:, H:2 * H] + gh[:, H:2 * H])
        n = jnp.tanh(gx[:, 2 * H:] + r * gh[:, 2 * H:])
        h = (1.0 - z) * n + z * h
        outs.append(h @ w_lin + b_lin)
    return jnp.stack(outs, axis=1)


if __name__ == "__main__":
    B, T, D, O = 2, 8, 16, 8   # batch, seq len, input_size, output_shape[1]

    key = jax.random.PRNGKey(0)
    k_x, k_p = jax.random.split(key)
    x = jax.random.normal(k_x, (B, T, D), dtype=jnp.float32)
    params = init_params(k_p, D, HIDDEN, O)
    prepared = prepare_params(params)

    fwd = jax.jit(gru_linear_forward, static_argnums=(2,))
    y = jax.block_until_ready(fwd(x, prepared, O))

    y_ref = reference_forward(x, params)
    assert y.shape == (B, T, O)
    # bf16 MXU operands -> tolerance re-validated vs the f32 reference
    # (recurrence error compounds over T); MATMUL_DTYPE=f32 recovers 1e-4.
    err = float(jnp.max(jnp.abs(y - y_ref)))
    assert jnp.allclose(y, y_ref, atol=3e-2, rtol=3e-2), err

    print("KERNEL_OK")
</pallas_src>

<mosaic_0001>
module attributes {stable_mosaic.version = 11 : i64} {
  func.func @gru_linear_kernel(%arg0: i32, %arg1: i32, %arg2: memref<1x64x16xf32, #tpu.memory_space<vmem>>, %arg3: memref<16x192xbf16, #tpu.memory_space<vmem>>, %arg4: memref<64x192xbf16, #tpu.memory_space<vmem>>, %arg5: memref<1x192xf32, #tpu.memory_space<vmem>>, %arg6: memref<1x64xf32, #tpu.memory_space<vmem>>, %arg7: memref<64x128xbf16, #tpu.memory_space<vmem>>, %arg8: memref<1x128xf32, #tpu.memory_space<vmem>>, %arg9: memref<1x64x128xf32, #tpu.memory_space<vmem>>, %arg10: memref<8x64xf32, #tpu.memory_space<vmem>>, %arg11: memref<64x192xf32, #tpu.memory_space<vmem>>, %arg12: memref<64x64xf32, #tpu.memory_space<vmem>>) attributes {dimension_semantics = [#tpu.dimension_semantics<parallel>, #tpu.dimension_semantics<arbitrary>], iteration_bounds = array<i64: 1, 1>, scalar_prefetch = 0 : i64, scratch_operands = 3 : i64, tpu.core_type = #tpu.core_type<tc>, window_params = [{transform_indices = @transform_0, window_bounds = array<i64: 1, 64, 16>}, {pipeline_mode = #tpu.pipeline_mode<synchronous>, transform_indices = @transform_1, window_bounds = array<i64: 16, 192>}, {pipeline_mode = #tpu.pipeline_mode<synchronous>, transform_indices = @transform_2, window_bounds = array<i64: 64, 192>}, {pipeline_mode = #tpu.pipeline_mode<synchronous>, transform_indices = @transform_3, window_bounds = array<i64: 1, 192>}, {pipeline_mode = #tpu.pipeline_mode<synchronous>, transform_indices = @transform_4, window_bounds = array<i64: 1, 64>}, {pipeline_mode = #tpu.pipeline_mode<synchronous>, transform_indices = @transform_5, window_bounds = array<i64: 64, 128>}, {pipeline_mode = #tpu.pipeline_mode<synchronous>, transform_indices = @transform_6, window_bounds = array<i64: 1, 128>}, {transform_indices = @transform_7, window_bounds = array<i64: 1, 64, 128>}]} {
    %c0_i32 = arith.constant 0 : i32
    %0 = arith.cmpi eq, %arg1, %c0_i32 : i32
    %1 = arith.extui %0 : i1 to i32
    %c0_i32_0 = arith.constant 0 : i32
    %2 = arith.cmpi ne, %1, %c0_i32_0 : i32
    scf.if %2 {
      %cst_76 = arith.constant 0.000000e+00 : f32
      %292 = vector.broadcast %cst_76 : f32 to vector<8x64xf32>
      %c0_77 = arith.constant 0 : index
      %c0_78 = arith.constant 0 : index
      %293 = vector.load %arg10[%c0_77, %c0_78] : memref<8x64xf32, #tpu.memory_space<vmem>>, vector<8x64xf32>
      tpu.vector_store %arg10[%c0_77, %c0_78], %292 {strides = array<i32>} : memref<8x64xf32, #tpu.memory_space<vmem>>, vector<8x64xf32>,
    } else {
    }
    %c0 = arith.constant 0 : index
    %c0_1 = arith.constant 0 : index
    %c0_2 = arith.constant 0 : index
    %3 = vector.load %arg2[%c0, %c0_1, %c0_2] : memref<1x64x16xf32, #tpu.memory_space<vmem>>, vector<1x64x16xf32>
    %4 = vector.shape_cast %3 : vector<1x64x16xf32> to vector<64x16xf32>
    %5 = arith.truncf %4 : vector<64x16xf32> to vector<64x16xbf16>
    %c0_3 = arith.constant 0 : index
    %c0_4 = arith.constant 0 : index
    %6 = vector.load %arg3[%c0_3, %c0_4] : memref<16x192xbf16, #tpu.memory_space<vmem>>, vector<16x192xbf16>
    %cst = arith.constant dense<0.000000e+00> : vector<64x192xf32>
    %7 = tpu.matmul %5, %6, %cst {dimension_numbers = #tpu.dot_dimension_numbers<[1], [0], [0], [1], [0, 0, 1, 1], [], []>} : vector<64x16xbf16>, vector<16x192xbf16>, vector<64x192xf32> -> vector<64x192xf32>
    %c0_5 = arith.constant 0 : index
    %c0_6 = arith.constant 0 : index
    %8 = vector.load %arg5[%c0_5, %c0_6] : memref<1x192xf32, #tpu.memory_space<vmem>>, vector<1x192xf32>
    %9 = vector.broadcast %8 : vector<1x192xf32> to vector<64x192xf32>
    %10 = arith.addf %7, %9 : vector<64x192xf32>
    %c0_7 = arith.constant 0 : index
    %c0_8 = arith.constant 0 : index
    %11 = vector.load %arg11[%c0_7, %c0_8] : memref<64x192xf32, #tpu.memory_space<vmem>>, vector<64x192xf32>
    tpu.vector_store %arg11[%c0_7, %c0_8], %10 {strides = array<i32>} : memref<64x192xf32, #tpu.memory_space<vmem>>, vector<64x192xf32>,
    %c0_9 = arith.constant 0 : index
    %c0_10 = arith.constant 0 : index
    %12 = vector.load %arg4[%c0_9, %c0_10] : memref<64x192xbf16, #tpu.memory_space<vmem>>, vector<64x192xbf16>
    %c0_11 = arith.constant 0 : index
    %c0_12 = arith.constant 0 : index
    %13 = vector.load %arg6[%c0_11, %c0_12] : memref<1x64xf32, #tpu.memory_space<vmem>>, vector<1x64xf32>
    %14 = vector.shape_cast %13 : vector<1x64xf32> to vector<1x64xf32>
    %15 = vector.broadcast %14 : vector<1x64xf32> to vector<8x64xf32>
    %c0_13 = arith.constant 0 : index
    %c0_14 = arith.constant 0 : index
    %16 = vector.load %arg10[%c0_13, %c0_14] : memref<8x64xf32, #tpu.memory_space<vmem>>, vector<8x64xf32>
    %c0_i32_15 = arith.constant 0 : i32
    %c8_i32 = arith.constant 8 : i32
    %17 = arith.muli %c0_i32_15, %c8_i32 : i32
    %18 = tpu.assume_multiple %17, 8 : i32
    %19 = arith.truncf %16 : vector<8x64xf32> to vector<8x64xbf16>
    %cst_16 = arith.constant dense<0.000000e+00> : vector<8x192xf32>
    %20 = tpu.matmul %19, %12, %cst_16 {dimension_numbers = #tpu.dot_dimension_numbers<[1], [0], [0], [1], [0, 0, 1, 1], [], []>} : vector<8x64xbf16>, vector<64x192xbf16>, vector<8x192xf32> -> vector<8x192xf32>
    %21 = arith.index_cast %18 : i32 to index
    %c0_17 = arith.constant 0 : index
    %22 = vector.load %arg11[%21, %c0_17] : memref<64x192xf32, #tpu.memory_space<vmem>>, vector<8x192xf32>
    %23 = vector.extract_strided_slice %22 {offsets = [0, 0], sizes = [8, 64], strides = [1, 1]} : vector<8x192xf32> to vector<8x64xf32>
    %24 = vector.extract_strided_slice %20 {offsets = [0, 0], sizes = [8, 64], strides = [1, 1]} : vector<8x192xf32> to vector<8x64xf32>
    %25 = arith.addf %23, %24 : vector<8x64xf32>
    %26 = arith.negf %25 : vector<8x64xf32>
    %27 = math.exp %26 : vector<8x64xf32>
    %cst_18 = arith.constant 1.000000e+00 : f32
    %28 = vector.broadcast %cst_18 : f32 to vector<8x64xf32>
    %29 = arith.addf %28, %27 : vector<8x64xf32>
    %30 = arith.divf %28, %29 : vector<8x64xf32>
    %31 = vector.extract_strided_slice %22 {offsets = [0, 64], sizes = [8, 64], strides = [1, 1]} : vector<8x192xf32> to vector<8x64xf32>
    %32 = vector.extract_strided_slice %20 {offsets = [0, 64], sizes = [8, 64], strides = [1, 1]} : vector<8x192xf32> to vector<8x64xf32>
    %33 = arith.addf %31, %32 : vector<8x64xf32>
    %34 = arith.negf %33 : vector<8x64xf32>
    %35 = math.exp %34 : vector<8x64xf32>
    %cst_19 = arith.constant 1.000000e+00 : f32
    %36 = vector.broadcast %cst_19 : f32 to vector<8x64xf32>
    %37 = arith.addf %36, %35 : vector<8x64xf32>
    %38 = arith.divf %36, %37 : vector<8x64xf32>
    %39 = vector.extract_strided_slice %22 {offsets = [0, 128], sizes = [8, 64], strides = [1, 1]} : vector<8x192xf32> to vector<8x64xf32>
    %40 = vector.extract_strided_slice %20 {offsets = [0, 128], sizes = [8, 64], strides = [1, 1]} : vector<8x192xf32> to vector<8x64xf32>
    %41 = arith.addf %40, %15 : vector<8x64xf32>
    %42 = arith.mulf %30, %41 : vector<8x64xf32>
    %43 = arith.addf %39, %42 : vector<8x64xf32>
    %44 = math.tanh %43 : vector<8x64xf32>
    %45 = arith.subf %16, %44 : vector<8x64xf32>
    %46 = arith.mulf %38, %45 : vector<8x64xf32>
    %47 = arith.addf %44, %46 : vector<8x64xf32>
    %48 = arith.index_cast %18 : i32 to index
    %c0_20 = arith.constant 0 : index
    %49 = vector.load %arg12[%48, %c0_20] : memref<64x64xf32, #tpu.memory_space<vmem>>, vector<8x64xf32>
    tpu.vector_store %arg12[%48, %c0_20], %47 {strides = array<i32>} : memref<64x64xf32, #tpu.memory_space<vmem>>, vector<8x64xf32>,
    %c1_i32 = arith.constant 1 : i32
    %c8_i32_21 = arith.constant 8 : i32
    %50 = arith.muli %c1_i32, %c8_i32_21 : i32
    %51 = tpu.assume_multiple %50, 8 : i32
    %52 = arith.truncf %47 : vector<8x64xf32> to vector<8x64xbf16>
    %cst_22 = arith.constant dense<0.000000e+00> : vector<8x192xf32>
    %53 = tpu.matmul %52, %12, %cst_22 {dimension_numbers = #tpu.dot_dimension_numbers<[1], [0], [0], [1], [0, 0, 1, 1], [], []>} : vector<8x64xbf16>, vector<64x192xbf16>, vector<8x192xf32> -> vector<8x192xf32>
    %54 = arith.index_cast %51 : i32 to index
    %c0_23 = arith.constant 0 : index
    %55 = vector.load %arg11[%54, %c0_23] : memref<64x192xf32, #tpu.memory_space<vmem>>, vector<8x192xf32>
    %56 = vector.extract_strided_slice %55 {offsets = [0, 0], sizes = [8, 64], strides = [1, 1]} : vector<8x192xf32> to vector<8x64xf32>
    %57 = vector.extract_strided_slice %53 {offsets = [0, 0], sizes = [8, 64], strides = [1, 1]} : vector<8x192xf32> to vector<8x64xf32>
    %58 = arith.addf %56, %57 : vector<8x64xf32>
    %59 = arith.negf %58 : vector<8x64xf32>
    %60 = math.exp %59 : vector<8x64xf32>
    %cst_24 = arith.constant 1.000000e+00 : f32
    %61 = vector.broadcast %cst_24 : f32 to vector<8x64xf32>
    %62 = arith.addf %61, %60 : vector<8x64xf32>
    %63 = arith.divf %61, %62 : vector<8x64xf32>
    %64 = vector.extract_strided_slice %55 {offsets = [0, 64], sizes = [8, 64], strides = [1, 1]} : vector<8x192xf32> to vector<8x64xf32>
    %65 = vector.extract_strided_slice %53 {offsets = [0, 64], sizes = [8, 64], strides = [1, 1]} : vector<8x192xf32> to vector<8x64xf32>
    %66 = arith.addf %64, %65 : vector<8x64xf32>
    %67 = arith.negf %66 : vector<8x64xf32>
    %68 = math.exp %67 : vector<8x64xf32>
    %cst_25 = arith.constant 1.000000e+00 : f32
    %69 = vector.broadcast %cst_25 : f32 to vector<8x64xf32>
    %70 = arith.addf %69, %68 : vector<8x64xf32>
    %71 = arith.divf %69, %70 : vector<8x64xf32>
    %72 = vector.extract_strided_slice %55 {offsets = [0, 128], sizes = [8, 64], strides = [1, 1]} : vector<8x192xf32> to vector<8x64xf32>
    %73 = vector.extract_strided_slice %53 {offsets = [0, 128], sizes = [8, 64], strides = [1, 1]} : vector<8x192xf32> to vector<8x64xf32>
    %74 = arith.addf %73, %15 : vector<8x64xf32>
    %75 = arith.mulf %63, %74 : vector<8x64xf32>
    %76 = arith.addf %72, %75 : vector<8x64xf32>
    %77 = math.tanh %76 : vector<8x64xf32>
    %78 = arith.subf %47, %77 : vector<8x64xf32>
    %79 = arith.mulf %71, %78 : vector<8x64xf32>
    %80 = arith.addf %77, %79 : vector<8x64xf32>
    %81 = arith.index_cast %51 : i32 to index
    %c0_26 = arith.constant 0 : index
    %82 = vector.load %arg12[%81, %c0_26] : memref<64x64xf32, #tpu.memory_space<vmem>>, vector<8x64xf32>
    tpu.vector_store %arg12[%81, %c0_26], %80 {strides = array<i32>} : memref<64x64xf32, #tpu.memory_space<vmem>>, vector<8x64xf32>,
    %c2_i32 = arith.constant 2 : i32
    %c8_i32_27 = arith.constant 8 : i32
    %83 = arith.muli %c2_i32, %c8_i32_27 : i32
    %84 = tpu.assume_multiple %83, 8 : i32
    %85 = arith.truncf %80 : vector<8x64xf32> to vector<8x64xbf16>
    %cst_28 = arith.constant dense<0.000000e+00> : vector<8x192xf32>
    %86 = tpu.matmul %85, %12, %cst_28 {dimension_numbers = #tpu.dot_dimension_numbers<[1], [0], [0], [1], [0, 0, 1, 1], [], []>} : vector<8x64xbf16>, vector<64x192xbf16>, vector<8x192xf32> -> vector<8x192xf32>
    %87 = arith.index_cast %84 : i32 to index
    %c0_29 = arith.constant 0 : index
    %88 = vector.load %arg11[%87, %c0_29] : memref<64x192xf32, #tpu.memory_space<vmem>>, vector<8x192xf32>
    %89 = vector.extract_strided_slice %88 {offsets = [0, 0], sizes = [8, 64], strides = [1, 1]} : vector<8x192xf32> to vector<8x64xf32>
    %90 = vector.extract_strided_slice %86 {offsets = [0, 0], sizes = [8, 64], strides = [1, 1]} : vector<8x192xf32> to vector<8x64xf32>
    %91 = arith.addf %89, %90 : vector<8x64xf32>
    %92 = arith.negf %91 : vector<8x64xf32>
    %93 = math.exp %92 : vector<8x64xf32>
    %cst_30 = arith.constant 1.000000e+00 : f32
    %94 = vector.broadcast %cst_30 : f32 to vector<8x64xf32>
    %95 = arith.addf %94, %93 : vector<8x64xf32>
    %96 = arith.divf %94, %95 : vector<8x64xf32>
    %97 = vector.extract_strided_slice %88 {offsets = [0, 64], sizes = [8, 64], strides = [1, 1]} : vector<8x192xf32> to vector<8x64xf32>
    %98 = vector.extract_strided_slice %86 {offsets = [0, 64], sizes = [8, 64], strides = [1, 1]} : vector<8x192xf32> to vector<8x64xf32>
    %99 = arith.addf %97, %98 : vector<8x64xf32>
    %100 = arith.negf %99 : vector<8x64xf32>
    %101 = math.exp %100 : vector<8x64xf32>
    %cst_31 = arith.constant 1.000000e+00 : f32
    %102 = vector.broadcast %cst_31 : f32 to vector<8x64xf32>
    %103 = arith.addf %102, %101 : vector<8x64xf32>
    %104 = arith.divf %102, %103 : vector<8x64xf32>
    %105 = vector.extract_strided_slice %88 {offsets = [0, 128], sizes = [8, 64], strides = [1, 1]} : vector<8x192xf32> to vector<8x64xf32>
    %106 = vector.extract_strided_slice %86 {offsets = [0, 128], sizes = [8, 64], strides = [1, 1]} : vector<8x192xf32> to vector<8x64xf32>
    %107 = arith.addf %106, %15 : vector<8x64xf32>
    %108 = arith.mulf %96, %107 : vector<8x64xf32>
    %109 = arith.addf %105, %108 : vector<8x64xf32>
    %110 = math.tanh %109 : vector<8x64xf32>
    %111 = arith.subf %80, %110 : vector<8x64xf32>
    %112 = arith.mulf %104, %111 : vector<8x64xf32>
    %113 = arith.addf %110, %112 : vector<8x64xf32>
    %114 = arith.index_cast %84 : i32 to index
    %c0_32 = arith.constant 0 : index
    %115 = vector.load %arg12[%114, %c0_32] : memref<64x64xf32, #tpu.memory_space<vmem>>, vector<8x64xf32>
    tpu.vector_store %arg12[%114, %c0_32], %113 {strides = array<i32>} : memref<64x64xf32, #tpu.memory_space<vmem>>, vector<8x64xf32>,
    %c3_i32 = arith.constant 3 : i32
    %c8_i32_33 = arith.constant 8 : i32
    %116 = arith.muli %c3_i32, %c8_i32_33 : i32
    %117 = tpu.assume_multiple %116, 8 : i32
    %118 = arith.truncf %113 : vector<8x64xf32> to vector<8x64xbf16>
    %cst_34 = arith.constant dense<0.000000e+00> : vector<8x192xf32>
    %119 = tpu.matmul %118, %12, %cst_34 {dimension_numbers = #tpu.dot_dimension_numbers<[1], [0], [0], [1], [0, 0, 1, 1], [], []>} : vector<8x64xbf16>, vector<64x192xbf16>, vector<8x192xf32> -> vector<8x192xf32>
    %120 = arith.index_cast %117 : i32 to index
    %c0_35 = arith.constant 0 : index
    %121 = vector.load %arg11[%120, %c0_35] : memref<64x192xf32, #tpu.memory_space<vmem>>, vector<8x192xf32>
    %122 = vector.extract_strided_slice %121 {offsets = [0, 0], sizes = [8, 64], strides = [1, 1]} : vector<8x192xf32> to vector<8x64xf32>
    %123 = vector.extract_strided_slice %119 {offsets = [0, 0], sizes = [8, 64], strides = [1, 1]} : vector<8x192xf32> to vector<8x64xf32>
    %124 = arith.addf %122, %123 : vector<8x64xf32>
    %125 = arith.negf %124 : vector<8x64xf32>
    %126 = math.exp %125 : vector<8x64xf32>
    %cst_36 = arith.constant 1.000000e+00 : f32
    %127 = vector.broadcast %cst_36 : f32 to vector<8x64xf32>
    %128 = arith.addf %127, %126 : vector<8x64xf32>
    %129 = arith.divf %127, %128 : vector<8x64xf32>
    %130 = vector.extract_strided_slice %121 {offsets = [0, 64], sizes = [8, 64], strides = [1, 1]} : vector<8x192xf32> to vector<8x64xf32>
    %131 = vector.extract_strided_slice %119 {offsets = [0, 64], sizes = [8, 64], strides = [1, 1]} : vector<8x192xf32> to vector<8x64xf32>
    %132 = arith.addf %130, %131 : vector<8x64xf32>
    %133 = arith.negf %132 : vector<8x64xf32>
    %134 = math.exp %133 : vector<8x64xf32>
    %cst_37 = arith.constant 1.000000e+00 : f32
    %135 = vector.broadcast %cst_37 : f32 to vector<8x64xf32>
    %136 = arith.addf %135, %134 : vector<8x64xf32>
    %137 = arith.divf %135, %136 : vector<8x64xf32>
    %138 = vector.extract_strided_slice %121 {offsets = [0, 128], sizes = [8, 64], strides = [1, 1]} : vector<8x192xf32> to vector<8x64xf32>
    %139 = vector.extract_strided_slice %119 {offsets = [0, 128], sizes = [8, 64], strides = [1, 1]} : vector<8x192xf32> to vector<8x64xf32>
    %140 = arith.addf %139, %15 : vector<8x64xf32>
    %141 = arith.mulf %129, %140 : vector<8x64xf32>
    %142 = arith.addf %138, %141 : vector<8x64xf32>
    %143 = math.tanh %142 : vector<8x64xf32>
    %144 = arith.subf %113, %143 : vector<8x64xf32>
    %145 = arith.mulf %137, %144 : vector<8x64xf32>
    %146 = arith.addf %143, %145 : vector<8x64xf32>
    %147 = arith.index_cast %117 : i32 to index
    %c0_38 = arith.constant 0 : index
    %148 = vector.load %arg12[%147, %c0_38] : memref<64x64xf32, #tpu.memory_space<vmem>>, vector<8x64xf32>
    tpu.vector_store %arg12[%147, %c0_38], %146 {strides = array<i32>} : memref<64x64xf32, #tpu.memory_space<vmem>>, vector<8x64xf32>,
    %c4_i32 = arith.constant 4 : i32
    %c8_i32_39 = arith.constant 8 : i32
    %149 = arith.muli %c4_i32, %c8_i32_39 : i32
    %150 = tpu.assume_multiple %149, 8 : i32
    %151 = arith.truncf %146 : vector<8x64xf32> to vector<8x64xbf16>
    %cst_40 = arith.constant dense<0.000000e+00> : vector<8x192xf32>
    %152 = tpu.matmul %151, %12, %cst_40 {dimension_numbers = #tpu.dot_dimension_numbers<[1], [0], [0], [1], [0, 0, 1, 1], [], []>} : vector<8x64xbf16>, vector<64x192xbf16>, vector<8x192xf32> -> vector<8x192xf32>
    %153 = arith.index_cast %150 : i32 to index
    %c0_41 = arith.constant 0 : index
    %154 = vector.load %arg11[%153, %c0_41] : memref<64x192xf32, #tpu.memory_space<vmem>>, vector<8x192xf32>
    %155 = vector.extract_strided_slice %154 {offsets = [0, 0], sizes = [8, 64], strides = [1, 1]} : vector<8x192xf32> to vector<8x64xf32>
    %156 = vector.extract_strided_slice %152 {offsets = [0, 0], sizes = [8, 64], strides = [1, 1]} : vector<8x192xf32> to vector<8x64xf32>
    %157 = arith.addf %155, %156 : vector<8x64xf32>
    %158 = arith.negf %157 : vector<8x64xf32>
    %159 = math.exp %158 : vector<8x64xf32>
    %cst_42 = arith.constant 1.000000e+00 : f32
    %160 = vector.broadcast %cst_42 : f32 to vector<8x64xf32>
    %161 = arith.addf %160, %159 : vector<8x64xf32>
    %162 = arith.divf %160, %161 : vector<8x64xf32>
    %163 = vector.extract_strided_slice %154 {offsets = [0, 64], sizes = [8, 64], strides = [1, 1]} : vector<8x192xf32> to vector<8x64xf32>
    %164 = vector.extract_strided_slice %152 {offsets = [0, 64], sizes = [8, 64], strides = [1, 1]} : vector<8x192xf32> to vector<8x64xf32>
    %165 = arith.addf %163, %164 : vector<8x64xf32>
    %166 = arith.negf %165 : vector<8x64xf32>
    %167 = math.exp %166 : vector<8x64xf32>
    %cst_43 = arith.constant 1.000000e+00 : f32
    %168 = vector.broadcast %cst_43 : f32 to vector<8x64xf32>
    %169 = arith.addf %168, %167 : vector<8x64xf32>
    %170 = arith.divf %168, %169 : vector<8x64xf32>
    %171 = vector.extract_strided_slice %154 {offsets = [0, 128], sizes = [8, 64], strides = [1, 1]} : vector<8x192xf32> to vector<8x64xf32>
    %172 = vector.extract_strided_slice %152 {offsets = [0, 128], sizes = [8, 64], strides = [1, 1]} : vector<8x192xf32> to vector<8x64xf32>
    %173 = arith.addf %172, %15 : vector<8x64xf32>
    %174 = arith.mulf %162, %173 : vector<8x64xf32>
    %175 = arith.addf %171, %174 : vector<8x64xf32>
    %176 = math.tanh %175 : vector<8x64xf32>
    %177 = arith.subf %146, %176 : vector<8x64xf32>
    %178 = arith.mulf %170, %177 : vector<8x64xf32>
    %179 = arith.addf %176, %178 : vector<8x64xf32>
    %180 = arith.index_cast %150 : i32 to index
    %c0_44 = arith.constant 0 : index
    %181 = vector.load %arg12[%180, %c0_44] : memref<64x64xf32, #tpu.memory_space<vmem>>, vector<8x64xf32>
    tpu.vector_store %arg12[%180, %c0_44], %179 {strides = array<i32>} : memref<64x64xf32, #tpu.memory_space<vmem>>, vector<8x64xf32>,
    %c5_i32 = arith.constant 5 : i32
    %c8_i32_45 = arith.constant 8 : i32
    %182 = arith.muli %c5_i32, %c8_i32_45 : i32
    %183 = tpu.assume_multiple %182, 8 : i32
    %184 = arith.truncf %179 : vector<8x64xf32> to vector<8x64xbf16>
    %cst_46 = arith.constant dense<0.000000e+00> : vector<8x192xf32>
    %185 = tpu.matmul %184, %12, %cst_46 {dimension_numbers = #tpu.dot_dimension_numbers<[1], [0], [0], [1], [0, 0, 1, 1], [], []>} : vector<8x64xbf16>, vector<64x192xbf16>, vector<8x192xf32> -> vector<8x192xf32>
    %186 = arith.index_cast %183 : i32 to index
    %c0_47 = arith.constant 0 : index
    %187 = vector.load %arg11[%186, %c0_47] : memref<64x192xf32, #tpu.memory_space<vmem>>, vector<8x192xf32>
    %188 = vector.extract_strided_slice %187 {offsets = [0, 0], sizes = [8, 64], strides = [1, 1]} : vector<8x192xf32> to vector<8x64xf32>
    %189 = vector.extract_strided_slice %185 {offsets = [0, 0], sizes = [8, 64], strides = [1, 1]} : vector<8x192xf32> to vector<8x64xf32>
    %190 = arith.addf %188, %189 : vector<8x64xf32>
    %191 = arith.negf %190 : vector<8x64xf32>
    %192 = math.exp %191 : vector<8x64xf32>
    %cst_48 = arith.constant 1.000000e+00 : f32
    %193 = vector.broadcast %cst_48 : f32 to vector<8x64xf32>
    %194 = arith.addf %193, %192 : vector<8x64xf32>
    %195 = arith.divf %193, %194 : vector<8x64xf32>
    %196 = vector.extract_strided_slice %187 {offsets = [0, 64], sizes = [8, 64], strides = [1, 1]} : vector<8x192xf32> to vector<8x64xf32>
    %197 = vector.extract_strided_slice %185 {offsets = [0, 64], sizes = [8, 64], strides = [1, 1]} : vector<8x192xf32> to vector<8x64xf32>
    %198 = arith.addf %196, %197 : vector<8x64xf32>
    %199 = arith.negf %198 : vector<8x64xf32>
    %200 = math.exp %199 : vector<8x64xf32>
    %cst_49 = arith.constant 1.000000e+00 : f32
    %201 = vector.broadcast %cst_49 : f32 to vector<8x64xf32>
    %202 = arith.addf %201, %200 : vector<8x64xf32>
    %203 = arith.divf %201, %202 : vector<8x64xf32>
    %204 = vector.extract_strided_slice %187 {offsets = [0, 128], sizes = [8, 64], strides = [1, 1]} : vector<8x192xf32> to vector<8x64xf32>
    %205 = vector.extract_strided_slice %185 {offsets = [0, 128], sizes = [8, 64], strides = [1, 1]} : vector<8x192xf32> to vector<8x64xf32>
    %206 = arith.addf %205, %15 : vector<8x64xf32>
    %207 = arith.mulf %195, %206 : vector<8x64xf32>
    %208 = arith.addf %204, %207 : vector<8x64xf32>
    %209 = math.tanh %208 : vector<8x64xf32>
    %210 = arith.subf %179, %209 : vector<8x64xf32>
    %211 = arith.mulf %203, %210 : vector<8x64xf32>
    %212 = arith.addf %209, %211 : vector<8x64xf32>
    %213 = arith.index_cast %183 : i32 to index
    %c0_50 = arith.constant 0 : index
    %214 = vector.load %arg12[%213, %c0_50] : memref<64x64xf32, #tpu.memory_space<vmem>>, vector<8x64xf32>
    tpu.vector_store %arg12[%213, %c0_50], %212 {strides = array<i32>} : memref<64x64xf32, #tpu.memory_space<vmem>>, vector<8x64xf32>,
    %c6_i32 = arith.constant 6 : i32
    %c8_i32_51 = arith.constant 8 : i32
    %215 = arith.muli %c6_i32, %c8_i32_51 : i32
    %216 = tpu.assume_multiple %215, 8 : i32
    %217 = arith.truncf %212 : vector<8x64xf32> to vector<8x64xbf16>
    %cst_52 = arith.constant dense<0.000000e+00> : vector<8x192xf32>
    %218 = tpu.matmul %217, %12, %cst_52 {dimension_numbers = #tpu.dot_dimension_numbers<[1], [0], [0], [1], [0, 0, 1, 1], [], []>} : vector<8x64xbf16>, vector<64x192xbf16>, vector<8x192xf32> -> vector<8x192xf32>
    %219 = arith.index_cast %216 : i32 to index
    %c0_53 = arith.constant 0 : index
    %220 = vector.load %arg11[%219, %c0_53] : memref<64x192xf32, #tpu.memory_space<vmem>>, vector<8x192xf32>
    %221 = vector.extract_strided_slice %220 {offsets = [0, 0], sizes = [8, 64], strides = [1, 1]} : vector<8x192xf32> to vector<8x64xf32>
    %222 = vector.extract_strided_slice %218 {offsets = [0, 0], sizes = [8, 64], strides = [1, 1]} : vector<8x192xf32> to vector<8x64xf32>
    %223 = arith.addf %221, %222 : vector<8x64xf32>
    %224 = arith.negf %223 : vector<8x64xf32>
    %225 = math.exp %224 : vector<8x64xf32>
    %cst_54 = arith.constant 1.000000e+00 : f32
    %226 = vector.broadcast %cst_54 : f32 to vector<8x64xf32>
    %227 = arith.addf %226, %225 : vector<8x64xf32>
    %228 = arith.divf %226, %227 : vector<8x64xf32>
    %229 = vector.extract_strided_slice %220 {offsets = [0, 64], sizes = [8, 64], strides = [1, 1]} : vector<8x192xf32> to vector<8x64xf32>
    %230 = vector.extract_strided_slice %218 {offsets = [0, 64], sizes = [8, 64], strides = [1, 1]} : vector<8x192xf32> to vector<8x64xf32>
    %231 = arith.addf %229, %230 : vector<8x64xf32>
    %232 = arith.negf %231 : vector<8x64xf32>
    %233 = math.exp %232 : vector<8x64xf32>
    %cst_55 = arith.constant 1.000000e+00 : f32
    %234 = vector.broadcast %cst_55 : f32 to vector<8x64xf32>
    %235 = arith.addf %234, %233 : vector<8x64xf32>
    %236 = arith.divf %234, %235 : vector<8x64xf32>
    %237 = vector.extract_strided_slice %220 {offsets = [0, 128], sizes = [8, 64], strides = [1, 1]} : vector<8x192xf32> to vector<8x64xf32>
    %238 = vector.extract_strided_slice %218 {offsets = [0, 128], sizes = [8, 64], strides = [1, 1]} : vector<8x192xf32> to vector<8x64xf32>
    %239 = arith.addf %238, %15 : vector<8x64xf32>
    %240 = arith.mulf %228, %239 : vector<8x64xf32>
    %241 = arith.addf %237, %240 : vector<8x64xf32>
    %242 = math.tanh %241 : vector<8x64xf32>
    %243 = arith.subf %212, %242 : vector<8x64xf32>
    %244 = arith.mulf %236, %243 : vector<8x64xf32>
    %245 = arith.addf %242, %244 : vector<8x64xf32>
    %246 = arith.index_cast %216 : i32 to index
    %c0_56 = arith.constant 0 : index
    %247 = vector.load %arg12[%246, %c0_56] : memref<64x64xf32, #tpu.memory_space<vmem>>, vector<8x64xf32>
    tpu.vector_store %arg12[%246, %c0_56], %245 {strides = array<i32>} : memref<64x64xf32, #tpu.memory_space<vmem>>, vector<8x64xf32>,
    %c7_i32 = arith.constant 7 : i32
    %c8_i32_57 = arith.constant 8 : i32
    %248 = arith.muli %c7_i32, %c8_i32_57 : i32
    %249 = tpu.assume_multiple %248, 8 : i32
    %250 = arith.truncf %245 : vector<8x64xf32> to vector<8x64xbf16>
    %cst_58 = arith.constant dense<0.000000e+00> : vector<8x192xf32>
    %251 = tpu.matmul %250, %12, %cst_58 {dimension_numbers = #tpu.dot_dimension_numbers<[1], [0], [0], [1], [0, 0, 1, 1], [], []>} : vector<8x64xbf16>, vector<64x192xbf16>, vector<8x192xf32> -> vector<8x192xf32>
    %252 = arith.index_cast %249 : i32 to index
    %c0_59 = arith.constant 0 : index
    %253 = vector.load %arg11[%252, %c0_59] : memref<64x192xf32, #tpu.memory_space<vmem>>, vector<8x192xf32>
    %254 = vector.extract_strided_slice %253 {offsets = [0, 0], sizes = [8, 64], strides = [1, 1]} : vector<8x192xf32> to vector<8x64xf32>
    %255 = vector.extract_strided_slice %251 {offsets = [0, 0], sizes = [8, 64], strides = [1, 1]} : vector<8x192xf32> to vector<8x64xf32>
    %256 = arith.addf %254, %255 : vector<8x64xf32>
    %257 = arith.negf %256 : vector<8x64xf32>
    %258 = math.exp %257 : vector<8x64xf32>
    %cst_60 = arith.constant 1.000000e+00 : f32
    %259 = vector.broadcast %cst_60 : f32 to vector<8x64xf32>
    %260 = arith.addf %259, %258 : vector<8x64xf32>
    %261 = arith.divf %259, %260 : vector<8x64xf32>
    %262 = vector.extract_strided_slice %253 {offsets = [0, 64], sizes = [8, 64], strides = [1, 1]} : vector<8x192xf32> to vector<8x64xf32>
    %263 = vector.extract_strided_slice %251 {offsets = [0, 64], sizes = [8, 64], strides = [1, 1]} : vector<8x192xf32> to vector<8x64xf32>
    %264 = arith.addf %262, %263 : vector<8x64xf32>
    %265 = arith.negf %264 : vector<8x64xf32>
    %266 = math.exp %265 : vector<8x64xf32>
    %cst_61 = arith.constant 1.000000e+00 : f32
    %267 = vector.broadcast %cst_61 : f32 to vector<8x64xf32>
    %268 = arith.addf %267, %266 : vector<8x64xf32>
    %269 = arith.divf %267, %268 : vector<8x64xf32>
    %270 = vector.extract_strided_slice %253 {offsets = [0, 128], sizes = [8, 64], strides = [1, 1]} : vector<8x192xf32> to vector<8x64xf32>
    %271 = vector.extract_strided_slice %251 {offsets = [0, 128], sizes = [8, 64], strides = [1, 1]} : vector<8x192xf32> to vector<8x64xf32>
    %272 = arith.addf %271, %15 : vector<8x64xf32>
    %273 = arith.mulf %261, %272 : vector<8x64xf32>
    %274 = arith.addf %270, %273 : vector<8x64xf32>
    %275 = math.tanh %274 : vector<8x64xf32>
    %276 = arith.subf %245, %275 : vector<8x64xf32>
    %277 = arith.mulf %269, %276 : vector<8x64xf32>
    %278 = arith.addf %275, %277 : vector<8x64xf32>
    %279 = arith.index_cast %249 : i32 to index
    %c0_62 = arith.constant 0 : index
    %280 = vector.load %arg12[%279, %c0_62] : memref<64x64xf32, #tpu.memory_space<vmem>>, vector<8x64xf32>
    tpu.vector_store %arg12[%279, %c0_62], %278 {strides = array<i32>} : memref<64x64xf32, #tpu.memory_space<vmem>>, vector<8x64xf32>,
    %c8_i32_63 = arith.constant 8 : i32
    %c0_64 = arith.constant 0 : index
    %c0_65 = arith.constant 0 : index
    %281 = vector.load %arg10[%c0_64, %c0_65] : memref<8x64xf32, #tpu.memory_space<vmem>>, vector<8x64xf32>
    tpu.vector_store %arg10[%c0_64, %c0_65], %278 {strides = array<i32>} : memref<8x64xf32, #tpu.memory_space<vmem>>, vector<8x64xf32>,
    %c0_66 = arith.constant 0 : index
    %c0_67 = arith.constant 0 : index
    %282 = vector.load %arg12[%c0_66, %c0_67] : memref<64x64xf32, #tpu.memory_space<vmem>>, vector<64x64xf32>
    %283 = arith.truncf %282 : vector<64x64xf32> to vector<64x64xbf16>
    %c0_68 = arith.constant 0 : index
    %c0_69 = arith.constant 0 : index
    %284 = vector.load %arg7[%c0_68, %c0_69] : memref<64x128xbf16, #tpu.memory_space<vmem>>, vector<64x128xbf16>
    %cst_70 = arith.constant dense<0.000000e+00> : vector<64x128xf32>
    %285 = tpu.matmul %283, %284, %cst_70 {dimension_numbers = #tpu.dot_dimension_numbers<[1], [0], [0], [1], [0, 0, 1, 1], [], []>} : vector<64x64xbf16>, vector<64x128xbf16>, vector<64x128xf32> -> vector<64x128xf32>
    %c0_71 = arith.constant 0 : index
    %c0_72 = arith.constant 0 : index
    %286 = vector.load %arg8[%c0_71, %c0_72] : memref<1x128xf32, #tpu.memory_space<vmem>>, vector<1x128xf32>
    %287 = vector.broadcast %286 : vector<1x128xf32> to vector<64x128xf32>
    %288 = arith.addf %285, %287 : vector<64x128xf32>
    %c0_73 = arith.constant 0 : index
    %c0_74 = arith.constant 0 : index
    %c0_75 = arith.constant 0 : index
    %289 = vector.load %arg9[%c0_73, %c0_74, %c0_75] : memref<1x64x128xf32, #tpu.memory_space<vmem>>, vector<1x64x128xf32>
    %290 = vector.shape_cast %289 : vector<1x64x128xf32> to vector<64x128xf32>
    %291 = vector.shape_cast %288 : vector<64x128xf32> to vector<1x64x128xf32>
    tpu.vector_store %arg9[%c0_73, %c0_74, %c0_75], %291 {strides = array<i32>} : memref<1x64x128xf32, #tpu.memory_space<vmem>>, vector<1x64x128xf32>,
    return
  }
  func.func @transform_0(%arg0: i32, %arg1: i32) -> (i32, i32, i32) {
    %c0_i32 = arith.constant 0 : i32
    %c0_i32_0 = arith.constant 0 : i32
    return %arg0, %arg1, %c0_i32 : i32, i32, i32
  }
  func.func @transform_1(%arg0: i32, %arg1: i32) -> (i32, i32) {
    %c0_i32 = arith.constant 0 : i32
    %c0_i32_0 = arith.constant 0 : i32
    %c0_i32_1 = arith.constant 0 : i32
    return %c0_i32, %c0_i32_0 : i32, i32
  }
  func.func @transform_2(%arg0: i32, %arg1: i32) -> (i32, i32) {
    %c0_i32 = arith.constant 0 : i32
    %c0_i32_0 = arith.constant 0 : i32
    %c0_i32_1 = arith.constant 0 : i32
    return %c0_i32, %c0_i32_0 : i32, i32
  }
  func.func @transform_3(%arg0: i32, %arg1: i32) -> (i32, i32) {
    %c0_i32 = arith.constant 0 : i32
    %c0_i32_0 = arith.constant 0 : i32
    %c0_i32_1 = arith.constant 0 : i32
    return %c0_i32, %c0_i32_0 : i32, i32
  }
  func.func @transform_4(%arg0: i32, %arg1: i32) -> (i32, i32) {
    %c0_i32 = arith.constant 0 : i32
    %c0_i32_0 = arith.constant 0 : i32
    %c0_i32_1 = arith.constant 0 : i32
    return %c0_i32, %c0_i32_0 : i32, i32
  }
  func.func @transform_5(%arg0: i32, %arg1: i32) -> (i32, i32) {
    %c0_i32 = arith.constant 0 : i32
    %c0_i32_0 = arith.constant 0 : i32
    %c0_i32_1 = arith.constant 0 : i32
    return %c0_i32, %c0_i32_0 : i32, i32
  }
  func.func @transform_6(%arg0: i32, %arg1: i32) -> (i32, i32) {
    %c0_i32 = arith.constant 0 : i32
    %c0_i32_0 = arith.constant 0 : i32
    %c0_i32_1 = arith.constant 0 : i32
    return %c0_i32, %c0_i32_0 : i32, i32
  }
  func.func @transform_7(%arg0: i32, %arg1: i32) -> (i32, i32, i32) {
    %c0_i32 = arith.constant 0 : i32
    %c0_i32_0 = arith.constant 0 : i32
    return %arg0, %arg1, %c0_i32 : i32, i32, i32
  }
}

</mosaic_0001>

<bundles_post_ra>
// kernel: gru_linear_forward.1
= control target key start
LH: loop header
LB: loop body
LE: loop exit
PB: predicated region body
PF: predicated region fallthrough
CT: control target
= control target key end

     0   :  { %vm31_vm0 = vcmask 523264   ;;  %v1103_v1 = vmov 0   ;;  %v1104_v2 = vmov 0.0   ;;  %vm69_vm1 = vcmask 130048   ;;  %s1444_s1 = inlined_call_operand.vmem [shape: bf16[16,192], index: 1, kind: input, shape index: {}]   ;;  %s1445_s0 = inlined_call_operand.vmem [shape: f32[1,64,16], index: 0, kind: input, shape index: {}]   ;;  %s1446_s2 = inlined_call_operand.vmem [shape: bf16[64,192], index: 2, kind: input, shape index: {}]   ;;  %s1447_s3 = inlined_call_operand.vmem [shape: f32[1,192], index: 3, kind: input, shape index: {}]   ;;  %s1448_s4 = inlined_call_operand.vmem [shape: f32[1,64], index: 4, kind: input, shape index: {}]   ;;  %s1449_s5 = inlined_call_operand.vmem [shape: bf16[64,128], index: 5, kind: input, shape index: {}]   ;;  %s1450_s6 = inlined_call_operand.vmem [shape: f32[1,128], index: 6, kind: input, shape index: {}]   ;;  %s1451_s7 = inlined_call_operand.vmem [shape: f32[1,64,128], index: 7, kind: output, shape index: {}]  }
   0x1   :  { %v1036_v0 = vld [vmem:[%s1444_s1 + $0x4] ss:$8 sps:$4 sm:$0xff]   ;;  %134 = vmatprep.mubr.bf16.mxu1 %v1103_v1  ;;  %114 = vmatprep.mubr.bf16.mxu0 %v1103_v1  ;;  %32 = vst.msk [vmem:[#allocation2] sm:$0xff] %vm31_vm0, %v1104_v2  ;;  %v1038_v3 = vld [vmem:[%s1444_s1] ss:$8 sps:$4 sm:$0xff]   ;;  %v39_v14 = vld [vmem:[%s1445_s0 + $0x30] sm:$0xff]  ;;  %v49_v23 = vlaneseq }
   0x2   :  { %v37_v4 = vld [vmem:[%s1445_s0 + $0x20] sm:$0xff]  ;;  %v38_v5 = vld [vmem:[%s1445_s0 + $0x28] sm:$0xff]  ;;  %1031 = vmatprep.subr.bf16.mxu1 %v1036_v0  ;;  %82 = vmatprep.subr.bf16.mxu0 %v1036_v0  ;;  %v1181_v12 = vld [vmem:[%s1446_s2 + $0x14] ss:$8 sps:$4 sm:$0xff]   ;;  %s1105_s1 = smov 64  }
   0x3   :  { %v43_v6 = vpack.c.bf16 %v38_v5, %v37_v4  ;;  %v1164_v7 = vld [vmem:[%s1446_s2 + $0x4] ss:$8 sps:$4 sm:$0xff]   ;;  %1032 = vmatpush1.bf16.msra.mxu1 %v1038_v3  ;;  %83 = vmatpush1.bf16.msra.mxu0 %v1038_v3  ;;  %v1169_v8 = vld [vmem:[%s1446_s2] ss:$8 sps:$4 sm:$0xff]   ;;  %v1187_v13 = vld [vmem:[%s1446_s2 + $0x10] ss:$8 sps:$4 sm:$0xff]  }
   0x4   :  { %v33_v9 = vld [vmem:[%s1445_s0] sm:$0xff]  ;;  %v34_v10 = vld [vmem:[%s1445_s0 + $0x8] sm:$0xff]  ;;  %232 = vmatprep.subr.bf16.mxu1 %v1164_v7  ;;  %379 = vmatprep.subr.bf16.mxu0 %v1164_v7  ;;  %v40_v15 = vld [vmem:[%s1445_s0 + $0x38] sm:$0xff]  ;;  %v50_v24 = vshrl.u32 %v49_v23, 7 }
   0x5   :  { %v41_v11 = vpack.c.bf16 %v34_v10, %v33_v9  ;;  %v1203_v16 = vld [vmem:[%s1446_s2 + $0x24] ss:$8 sps:$4 sm:$0xff]   ;;  %v44_v17 = vpack.c.bf16 %v40_v15, %v39_v14  ;;  %v1212_v18 = vld [vmem:[%s1446_s2 + $0x20] ss:$8 sps:$4 sm:$0xff]   ;;  %v1218_v19 = vld [vmem:[%s1446_s2 + $0x34] ss:$8 sps:$4 sm:$0xff]  }
   0x6   :  { %971 = vmatmul.mubr.msk.bf16.vlgmr.msra.gmra.mrb[0].mxu1 %vm69_vm1, %v43_v6  ;;  %v1227_v20 = vld [vmem:[%s1446_s2 + $0x30] ss:$8 sps:$4 sm:$0xff]   ;;  %v51_v25 = vsub.s32 0, %v50_v24  ;;  %v47_v26 = vld [vmem:[%s1447_s3] sm:$0x3]  ;;  %v55_v27 = vsub.s32 1, %v50_v24 }
   0x7   :  { %969 = vmatmul.mubr.msk.bf16.vlgmr.msra.gmra.mrb[0].mxu0 %vm69_vm1, %v41_v11  ;;  %233 = vmatpush1.bf16.msra.mxu1 %v1169_v8  ;;  %v1287_v62 = vld [vmem:[%s1448_s4] ss:$0 sm:$0xff] }
   0x8   :  { %144 = vmatprep.mubr.bf16.mxu1 %v1103_v1  ;;  %234 = vmatprep.subr.bf16.mxu1 %v1181_v12  ;;  %v1230_v21 = vld [vmem:[#allocation2] sm:$0xff]  ;;  %v1254_v28 = vrot.slane %v47_v26, %v51_v25  ;;  %v1256_v29 = vrot.slane %v47_v26, %v55_v27 }
   0x9   :  { %380 = vmatpush1.bf16.msra.mxu0 %v1169_v8  ;;  %124 = vmatprep.mubr.bf16.mxu0 %v1103_v1  ;;  %v188_v22 = vpack.c.bf16 %v1230_v21, %v1230_v21 }
   0xa   :  { %381 = vmatprep.subr.bf16.mxu0 %v1181_v12 }
   0xb   :  { %235 = vmatpush1.bf16.msra.mxu1 %v1187_v13 }
   0xc   :  { %236 = vmatprep.subr.bf16.mxu1 %v1203_v16 }
   0xd   :  { %382 = vmatpush1.bf16.msra.mxu0 %v1187_v13 }
   0xe   :  { %383 = vmatprep.subr.bf16.mxu0 %v1203_v16  ;;  %972 = vmatmul.mubr.msk.bf16.gmra.mrb[4].mxu1 %vm69_vm1, %v44_v17 }
   0xf   :  { %237 = vmatpush1.bf16.msra.mxu1 %v1212_v18  ;;  %264 = vmatprep.mubr.bf16.mxu1 %v1103_v1 }
  0x10   :  { %238 = vmatprep.subr.bf16.mxu1 %v1218_v19 }
  0x11   :  { %384 = vmatpush1.bf16.msra.mxu0 %v1212_v18 }
  0x12   :  { %385 = vmatprep.subr.bf16.mxu0 %v1218_v19 }
  0x13   :  { %239 = vmatpush1.bf16.msra.mxu1 %v1227_v20 }
  0x14   :  { %305 = vmatprep.subr.bf16.mxu1 %v1164_v7 }
  0x15   :  { %386 = vmatpush1.bf16.msra.mxu0 %v1227_v20 }
  0x16   :  { %527 = vmatprep.subr.bf16.mxu0 %v1164_v7  ;;  %982 = vmatmul.mubr.msk.bf16.vlgmr.msra.gmra.mrb[8].mxu1 %vm31_vm0, %v188_v22 }
  0x17   :  { %306 = vmatpush1.bf16.msra.mxu1 %v1169_v8  ;;  %337 = vmatprep.mubr.bf16.mxu1 %v1103_v1 }
  0x18   :  { %307 = vmatprep.subr.bf16.mxu1 %v1181_v12 }
  0x1b   :  { %308 = vmatpush1.bf16.msra.mxu1 %v1187_v13 }
  0x1c   :  { %309 = vmatprep.subr.bf16.mxu1 %v1203_v16 }
  0x1f   :  { %310 = vmatpush1.bf16.msra.mxu1 %v1212_v18 }
  0x20   :  { %311 = vmatprep.subr.bf16.mxu1 %v1218_v19 }
  0x23   :  { %312 = vmatpush1.bf16.msra.mxu1 %v1227_v20 }
  0x24   :  { %453 = vmatprep.subr.bf16.mxu1 %v1164_v7 }
  0xd9   :  { %v136_v30 = vpop.f32.mrb[0].mxu1 }
  0xda   :  { %v116_v31 = vpop.f32.mrb[0].mxu0  ;;  %v1259_v32 = vadd.f32 %v136_v30, %v1254_v28  ;;  %v138_v33 = vpop.f32.mrb[1].mxu1 }
  0xdb   :  { %v117_v34 = vadd.f32 %v116_v31, %v1254_v28  ;;  %v118_v35 = vpop.f32.mrb[1].mxu0  ;;  %v139_v36 = vadd.f32 %v138_v33, %v1256_v29  ;;  %v140_v37 = vpop.f32.mrb[2].mxu1 }
  0xdc   :  { %v119_v38 = vadd.f32 %v118_v35, %v1256_v29  ;;  %v120_v39 = vpop.f32.mrb[2].mxu0  ;;  %v1265_v40 = vadd.f32 %v140_v37, %v1254_v28  ;;  %v142_v41 = vpop.f32.mrb[3].mxu1  ;;  %v36_v37 = vld [vmem:[%s1445_s0 + $0x18] sm:$0xff] }
  0xdd   :  { %v121_v42 = vadd.f32 %v120_v39, %v1254_v28  ;;  %v122_v43 = vpop.f32.mrb[3].mxu0  ;;  %165 = vst.msk [vmem:[#allocation3 + $0x48] sm:$0xff] %vm31_vm0, %v139_v36  ;;  %v143_v44 = vadd.f32 %v142_v41, %v1256_v29  ;;  %v35_v36 = vld [vmem:[%s1445_s0 + $0x10] sm:$0xff] }
  0xde   :  { %157 = vst.msk [vmem:[#allocation3 + $0x8] sm:$0xff] %vm31_vm0, %v119_v38  ;;  %v123_v45 = vadd.f32 %v122_v43, %v1256_v29  ;;  %v42_v38 = vpack.c.bf16 %v36_v37, %v35_v36 }
  0xdf   :  { %167 = vst.msk [vmem:[#allocation3 + $0x58] sm:$0xff] %vm31_vm0, %v143_v44 }
  0xe0   :  { %159 = vst.msk [vmem:[#allocation3 + $0x18] sm:$0xff] %vm31_vm0, %v123_v45  ;;  %970 = vmatmul.mubr.msk.bf16.gmra.mrb[4].mxu0 %vm69_vm1, %v42_v38 }
  0xe1   :  { %v146_v46 = vpop.f32.mrb[4].mxu1  ;;  %411 = vmatprep.mubr.bf16.mxu0 %v1103_v1 }
  0xe2   :  { %v1275_v47 = vadd.f32 %v146_v46, %v1254_v28  ;;  %v148_v48 = vpop.f32.mrb[5].mxu1 }
  0xe3   :  { %v149_v49 = vadd.f32 %v148_v48, %v1256_v29  ;;  %v150_v50 = vpop.f32.mrb[6].mxu1 }
  0xe4   :  { %v1279_v51 = vadd.f32 %v150_v50, %v1254_v28  ;;  %v152_v52 = vpop.f32.mrb[7].mxu1 }
  0xe5   :  { %169 = vst.msk [vmem:[#allocation3 + $0x68] sm:$0xff] %vm31_vm0, %v149_v49  ;;  %v153_v53 = vadd.f32 %v152_v52, %v1256_v29  ;;  %v277_v3 = vld [vmem:[#allocation3 + $0x8] sm:$0xff] }
  0xe7   :  { %171 = vst.msk [vmem:[#allocation3 + $0x78] sm:$0xff] %vm31_vm0, %v153_v53 }
  0xe9   :  { %v266_v54 = vpop.f32.mrb[8].mxu1 }
  0xea   :  { %v278_v55 = vadd.f32 %v266_v54, %v117_v34  ;;  %v268_v56 = vpop.f32.mrb[9].mxu1  ;;  %v350_v34 = vld [vmem:[#allocation3 + $0x18] sm:$0xff] }
  0xeb   :  { %v270_v57 = vpop.f32.mrb[10].mxu1  ;;  %v285_v63 = vadd.f32 %v1287_v62, %v268_v56 }
  0xec   :  { %v983_v58 = vmul.f32 -1.442695, %v278_v55  ;;  %v271_v59 = vpop.f32.mrb[11].mxu1 }
  0xee   :  { %1055 = vpow2.f32 %v983_v58 }
  0xf8   :  { %v1056_v60 = vpop.eup %1055 }
  0xf9   :  { %v282_v61 = vadd.f32 1.0, %v1056_v60 }
  0xfb   :  { %1057 = vrcp.f32 %v282_v61 }
 0x105   :  { %v1058_v0 = vpop.eup %1057 }
 0x106   :  { %v286_v2 = vmul.f32 %v1058_v0, %v285_v63 }
 0x108   :  { %v287_v4 = vadd.f32 %v286_v2, %v277_v3 }
 0x10a   :  { %1059 = vtanh.f32 %v287_v4 }
 0x114   :  { %v1060_v5 = vpop.eup %1059 }
 0x115   :  { %v289_v6 = vsub.f32 %v1230_v21, %v1060_v5 }
 0x117   :  { %291 = vrot.lane.b32.xlu0 %v289_v6, %s1105_s1 }
 0x189   :  { %v292_v9 = vpop.permute.xlu0 %291 }
 0x18a   :  { %v294_v10 = vmul.f32 %v1058_v0, %v292_v9 }
 0x18c   :  { %296 = vrot.lane.b32.xlu0 %v294_v10, %s1105_s1 }
 0x1b3   :  { %v126_v44 = vpop.f32.mrb[4].mxu0 }
 0x1b4   :  { %v127_v45 = vadd.f32 %v126_v44, %v1254_v28  ;;  %v128_v46 = vpop.f32.mrb[5].mxu0 }
 0x1b5   :  { %v129_v48 = vadd.f32 %v128_v46, %v1256_v29  ;;  %v130_v49 = vpop.f32.mrb[6].mxu0 }
 0x1b6   :  { %v131_v50 = vadd.f32 %v130_v49, %v1254_v28  ;;  %v132_v52 = vpop.f32.mrb[7].mxu0 }
 0x1b7   :  { %161 = vst.msk [vmem:[#allocation3 + $0x28] sm:$0xff] %vm31_vm0, %v129_v48  ;;  %v133_v53 = vadd.f32 %v132_v52, %v1256_v29 }
 0x1b9   :  { %163 = vst.msk [vmem:[#allocation3 + $0x38] sm:$0xff] %vm31_vm0, %v133_v53 }
 0x1be   :  { %v424_v4 = vld [vmem:[#allocation3 + $0x28] sm:$0xff] }
 0x1fe   :  { %v297_v11 = vpop.permute.xlu0 %296 }
 0x1ff   :  { %v299_v14 = vadd.f32 %v1060_v5, %v297_v11 }
 0x201   :  { %300 = vst.msk [vmem:[#allocation4] sm:$0xff] %vm31_vm0, %v299_v14  ;;  %v301_v15 = vpack.c.bf16 %v299_v14, %v299_v14 }
 0x203   :  { %984 = vmatmul.mubr.msk.bf16.vlgmr.msra.gmra.mrb[12].mxu1 %vm31_vm0, %v301_v15 }
 0x204   :  { %454 = vmatpush1.bf16.msra.mxu1 %v1169_v8  ;;  %485 = vmatprep.mubr.bf16.mxu1 %v1103_v1 }
 0x205   :  { %455 = vmatprep.subr.bf16.mxu1 %v1181_v12 }
 0x208   :  { %456 = vmatpush1.bf16.msra.mxu1 %v1187_v13 }
 0x209   :  { %457 = vmatprep.subr.bf16.mxu1 %v1203_v16 }
 0x20c   :  { %458 = vmatpush1.bf16.msra.mxu1 %v1212_v18 }
 0x20d   :  { %459 = vmatprep.subr.bf16.mxu1 %v1218_v19 }
 0x210   :  { %460 = vmatpush1.bf16.msra.mxu1 %v1227_v20 }
 0x211   :  { %601 = vmatprep.subr.bf16.mxu1 %v1164_v7 }
 0x2d6   :  { %v339_v17 = vpop.f32.mrb[12].mxu1 }
 0x2d7   :  { %v351_v21 = vadd.f32 %v339_v17, %v121_v42  ;;  %v341_v22 = vpop.f32.mrb[13].mxu1 }
 0x2d8   :  { %v343_v23 = vpop.f32.mrb[14].mxu1  ;;  %v358_v30 = vadd.f32 %v1287_v62, %v341_v22 }
 0x2d9   :  { %v985_v24 = vmul.f32 -1.442695, %v351_v21  ;;  %v344_v25 = vpop.f32.mrb[15].mxu1 }
 0x2db   :  { %1061 = vpow2.f32 %v985_v24 }
 0x2e5   :  { %v1062_v26 = vpop.eup %1061 }
 0x2e6   :  { %v355_v27 = vadd.f32 1.0, %v1062_v26 }
 0x2e8   :  { %1063 = vrcp.f32 %v355_v27 }
 0x2f2   :  { %v1064_v31 = vpop.eup %1063 }
 0x2f3   :  { %v359_v33 = vmul.f32 %v1064_v31, %v358_v30 }
 0x2f5   :  { %v360_v35 = vadd.f32 %v359_v33, %v350_v34 }
 0x2f7   :  { %1065 = vtanh.f32 %v360_v35  ;;  %v498_v35 = vld [vmem:[#allocation3 + $0x38] sm:$0xff] }
 0x301   :  { %v1066_v39 = vpop.eup %1065 }
 0x302   :  { %v362_v41 = vsub.f32 %v299_v14, %v1066_v39 }
 0x304   :  { %364 = vrot.lane.b32.xlu1 %v362_v41, %s1105_s1 }
 0x376   :  { %v365_v42 = vpop.permute.xlu1 %364 }
 0x377   :  { %v367_v43 = vmul.f32 %v1064_v31, %v365_v42 }
 0x379   :  { %369 = vrot.lane.b32.xlu1 %v367_v43, %s1105_s1 }
 0x3eb   :  { %v370_v54 = vpop.permute.xlu1 %369 }
 0x3ec   :  { %v372_v55 = vadd.f32 %v1066_v39, %v370_v54 }
 0x3ee   :  { %374 = vst.msk [vmem:[#allocation4 + $0x8] sm:$0xff] %vm31_vm0, %v372_v55  ;;  %v375_v56 = vpack.c.bf16 %v372_v55, %v372_v55 }
 0x3f0   :  { %986 = vmatmul.mubr.msk.bf16.vlgmr.msra.gmra.mrb[8].mxu0 %vm31_vm0, %v375_v56 }
 0x3f1   :  { %528 = vmatpush1.bf16.msra.mxu0 %v1169_v8  ;;  %559 = vmatprep.mubr.bf16.mxu0 %v1103_v1 }
 0x3f2   :  { %529 = vmatprep.subr.bf16.mxu0 %v1181_v12 }
 0x3f5   :  { %530 = vmatpush1.bf16.msra.mxu0 %v1187_v13 }
 0x3f6   :  { %531 = vmatprep.subr.bf16.mxu0 %v1203_v16 }
 0x3f9   :  { %532 = vmatpush1.bf16.msra.mxu0 %v1212_v18 }
 0x3fa   :  { %533 = vmatprep.subr.bf16.mxu0 %v1218_v19 }
 0x3fd   :  { %534 = vmatpush1.bf16.msra.mxu0 %v1227_v20 }
 0x3fe   :  { %675 = vmatprep.subr.bf16.mxu0 %v1164_v7 }
 0x4c3   :  { %v413_v28 = vpop.f32.mrb[8].mxu0 }
 0x4c4   :  { %v425_v29 = vadd.f32 %v413_v28, %v127_v45  ;;  %v415_v57 = vpop.f32.mrb[9].mxu0  ;;  %v572_v28 = vld [vmem:[#allocation3 + $0x48] sm:$0xff] }
 0x4c5   :  { %v417_v58 = vpop.f32.mrb[10].mxu0  ;;  %v432_v0 = vadd.f32 %v1287_v62, %v415_v57 }
 0x4c6   :  { %v987_v59 = vmul.f32 -1.442695, %v425_v29  ;;  %v418_v60 = vpop.f32.mrb[11].mxu0 }
 0x4c8   :  { %1067 = vpow2.f32 %v987_v59 }
 0x4d2   :  { %v1068_v61 = vpop.eup %1067 }
 0x4d3   :  { %v429_v63 = vadd.f32 1.0, %v1068_v61 }
 0x4d5   :  { %1069 = vrcp.f32 %v429_v63 }
 0x4df   :  { %v1070_v2 = vpop.eup %1069 }
 0x4e0   :  { %v433_v3 = vmul.f32 %v1070_v2, %v432_v0 }
 0x4e2   :  { %v434_v5 = vadd.f32 %v433_v3, %v424_v4 }
 0x4e4   :  { %1071 = vtanh.f32 %v434_v5 }
 0x4ee   :  { %v1072_v6 = vpop.eup %1071 }
 0x4ef   :  { %v436_v9 = vsub.f32 %v372_v55, %v1072_v6 }
 0x4f1   :  { %438 = vrot.lane.b32.xlu0 %v436_v9, %s1105_s1 }
 0x563   :  { %v439_v10 = vpop.permute.xlu0 %438 }
 0x564   :  { %v441_v11 = vmul.f32 %v1070_v2, %v439_v10 }
 0x566   :  { %443 = vrot.lane.b32.xlu1 %v441_v11, %s1105_s1 }
 0x5d8   :  { %v444_v14 = vpop.permute.xlu1 %443 }
 0x5d9   :  { %v446_v15 = vadd.f32 %v1072_v6, %v444_v14 }
 0x5db   :  { %448 = vst.msk [vmem:[#allocation4 + $0x10] sm:$0xff] %vm31_vm0, %v446_v15  ;;  %v449_v17 = vpack.c.bf16 %v446_v15, %v446_v15 }
 0x5dd   :  { %988 = vmatmul.mubr.msk.bf16.vlgmr.msra.gmra.mrb[16].mxu1 %vm31_vm0, %v449_v17  ;;  %v821_v17 = vld [vmem:[#allocation4 + $0x8] sm:$0xff] }
 0x5de   :  { %602 = vmatpush1.bf16.msra.mxu1 %v1169_v8  ;;  %633 = vmatprep.mubr.bf16.mxu1 %v1103_v1 }
 0x5df   :  { %603 = vmatprep.subr.bf16.mxu1 %v1181_v12 }
 0x5e2   :  { %604 = vmatpush1.bf16.msra.mxu1 %v1187_v13 }
 0x5e3   :  { %605 = vmatprep.subr.bf16.mxu1 %v1203_v16 }
 0x5e6   :  { %606 = vmatpush1.bf16.msra.mxu1 %v1212_v18 }
 0x5e7   :  { %607 = vmatprep.subr.bf16.mxu1 %v1218_v19 }
 0x5ea   :  { %608 = vmatpush1.bf16.msra.mxu1 %v1227_v20 }
 0x5eb   :  { %749 = vmatprep.subr.bf16.mxu1 %v1164_v7 }
 0x6b0   :  { %v487_v21 = vpop.f32.mrb[16].mxu1 }
 0x6b1   :  { %v499_v22 = vadd.f32 %v487_v21, %v131_v50  ;;  %v489_v23 = vpop.f32.mrb[17].mxu1 }
 0x6b2   :  { %v491_v24 = vpop.f32.mrb[18].mxu1  ;;  %v506_v31 = vadd.f32 %v1287_v62, %v489_v23  ;;  %v1052_v23 = vld [vmem:[%s1449_s5 + $0x8] sm:$0xff]  }
 0x6b3   :  { %v989_v25 = vmul.f32 -1.442695, %v499_v22  ;;  %v492_v26 = vpop.f32.mrb[19].mxu1  ;;  %v820_v22 = vld [vmem:[#allocation4] sm:$0xff] }
 0x6b4   :  { %v828_v24 = vpack.c.bf16 %v821_v17, %v820_v22  ;;  %v1054_v26 = vld [vmem:[%s1449_s5 + $0x18] sm:$0xff]  }
 0x6b5   :  { %1073 = vpow2.f32 %v989_v25  ;;  %v1053_v25 = vld [vmem:[%s1449_s5 + $0x10] sm:$0xff]  }
 0x6bf   :  { %v1074_v27 = vpop.eup %1073 }
 0x6c0   :  { %v503_v30 = vadd.f32 1.0, %v1074_v27 }
 0x6c2   :  { %1075 = vrcp.f32 %v503_v30 }
 0x6cc   :  { %v1076_v33 = vpop.eup %1075 }
 0x6cd   :  { %v507_v34 = vmul.f32 %v1076_v33, %v506_v31  ;;  %v822_v31 = vld [vmem:[#allocation4 + $0x10] sm:$0xff] }
 0x6cf   :  { %v508_v36 = vadd.f32 %v507_v34, %v498_v35 }
 0x6d1   :  { %1077 = vtanh.f32 %v508_v36 }
 0x6db   :  { %v1078_v37 = vpop.eup %1077 }
 0x6dc   :  { %v510_v38 = vsub.f32 %v446_v15, %v1078_v37 }
 0x6de   :  { %512 = vrot.lane.b32.xlu0 %v510_v38, %s1105_s1 }
 0x750   :  { %v513_v7 = vpop.permute.xlu0 %512 }
 0x751   :  { %v515_v39 = vmul.f32 %v1076_v33, %v513_v7 }
 0x753   :  { %517 = vrot.lane.b32.xlu1 %v515_v39, %s1105_s1 }
 0x7c5   :  { %v518_v41 = vpop.permute.xlu1 %517 }
 0x7c6   :  { %v520_v42 = vadd.f32 %v1078_v37, %v518_v41 }
 0x7c8   :  { %522 = vst.msk [vmem:[#allocation4 + $0x18] sm:$0xff] %vm31_vm0, %v520_v42  ;;  %v523_v43 = vpack.c.bf16 %v520_v42, %v520_v42 }
 0x7ca   :  { %990 = vmatmul.mubr.msk.bf16.vlgmr.msra.gmra.mrb[12].mxu0 %vm31_vm0, %v523_v43 }
 0x7cb   :  { %676 = vmatpush1.bf16.msra.mxu0 %v1169_v8  ;;  %707 = vmatprep.mubr.bf16.mxu0 %v1103_v1 }
 0x7cc   :  { %677 = vmatprep.subr.bf16.mxu0 %v1181_v12 }
 0x7cf   :  { %678 = vmatpush1.bf16.msra.mxu0 %v1187_v13  ;;  %v823_v27 = vld [vmem:[#allocation4 + $0x18] sm:$0xff] }
 0x7d0   :  { %679 = vmatprep.subr.bf16.mxu0 %v1203_v16  ;;  %v829_v33 = vpack.c.bf16 %v823_v27, %v822_v31 }
 0x7d3   :  { %680 = vmatpush1.bf16.msra.mxu0 %v1212_v18 }
 0x7d4   :  { %681 = vmatprep.subr.bf16.mxu0 %v1218_v19 }
 0x7d7   :  { %682 = vmatpush1.bf16.msra.mxu0 %v1227_v20 }
 0x89d   :  { %v561_v44 = vpop.f32.mrb[12].mxu0 }
 0x89e   :  { %v573_v45 = vadd.f32 %v561_v44, %v1259_v32  ;;  %v563_v46 = vpop.f32.mrb[13].mxu0 }
 0x89f   :  { %v565_v48 = vpop.f32.mrb[14].mxu0  ;;  %v580_v54 = vadd.f32 %v1287_v62, %v563_v46 }
 0x8a0   :  { %v991_v49 = vmul.f32 -1.442695, %v573_v45  ;;  %v566_v50 = vpop.f32.mrb[15].mxu0 }
 0x8a2   :  { %1079 = vpow2.f32 %v991_v49 }
 0x8ac   :  { %v1080_v52 = vpop.eup %1079 }
 0x8ad   :  { %v577_v53 = vadd.f32 1.0, %v1080_v52 }
 0x8af   :  { %1081 = vrcp.f32 %v577_v53 }
 0x8b9   :  { %v1082_v55 = vpop.eup %1081 }
 0x8ba   :  { %v581_v56 = vmul.f32 %v1082_v55, %v580_v54 }
 0x8bc   :  { %v582_v29 = vadd.f32 %v581_v56, %v572_v28  ;;  %v720_v28 = vld [vmem:[#allocation3 + $0x68] sm:$0xff] }
 0x8be   :  { %1083 = vtanh.f32 %v582_v29 }
 0x8c8   :  { %v1084_v57 = vpop.eup %1083 }
 0x8c9   :  { %v584_v58 = vsub.f32 %v520_v42, %v1084_v57  ;;  %v1398_v42 = vld [vmem:[%s1450_s6] ss:$0 sm:$0xff] }
 0x8cb   :  { %586 = vrot.lane.b32.xlu0 %v584_v58, %s1105_s1 }
 0x93d   :  { %v587_v32 = vpop.permute.xlu0 %586 }
 0x93e   :  { %v589_v59 = vmul.f32 %v1082_v55, %v587_v32 }
 0x940   :  { %591 = vrot.lane.b32.xlu1 %v589_v59, %s1105_s1 }
 0x9b2   :  { %v592_v60 = vpop.permute.xlu1 %591 }
 0x9b3   :  { %v594_v61 = vadd.f32 %v1084_v57, %v592_v60 }
 0x9b5   :  { %596 = vst.msk [vmem:[#allocation4 + $0x20] sm:$0xff] %vm31_vm0, %v594_v61  ;;  %v597_v63 = vpack.c.bf16 %v594_v61, %v594_v61 }
 0x9b7   :  { %992 = vmatmul.mubr.msk.bf16.vlgmr.msra.gmra.mrb[20].mxu1 %vm31_vm0, %v597_v63 }
 0x9b8   :  { %750 = vmatpush1.bf16.msra.mxu1 %v1169_v8  ;;  %781 = vmatprep.mubr.bf16.mxu1 %v1103_v1 }
 0x9b9   :  { %751 = vmatprep.subr.bf16.mxu1 %v1181_v12 }
 0x9bc   :  { %752 = vmatpush1.bf16.msra.mxu1 %v1187_v13  ;;  %v824_v34 = vld [vmem:[#allocation4 + $0x20] sm:$0xff] }
 0x9bd   :  { %753 = vmatprep.subr.bf16.mxu1 %v1203_v16 }
 0x9c0   :  { %754 = vmatpush1.bf16.msra.mxu1 %v1212_v18  ;;  %v646_v18 = vld [vmem:[#allocation3 + $0x58] sm:$0xff] }
 0x9c1   :  { %755 = vmatprep.subr.bf16.mxu1 %v1218_v19 }
 0x9c4   :  { %756 = vmatpush1.bf16.msra.mxu1 %v1227_v20 }
 0xa8a   :  { %v635_v0 = vpop.f32.mrb[20].mxu1 }
 0xa8b   :  { %v647_v2 = vadd.f32 %v635_v0, %v1265_v40  ;;  %v637_v3 = vpop.f32.mrb[21].mxu1  ;;  %v1051_v40 = vld [vmem:[%s1449_s5] sm:$0xff]  }
 0xa8c   :  { %v639_v4 = vpop.f32.mrb[22].mxu1  ;;  %v654_v13 = vadd.f32 %v1287_v62, %v637_v3  ;;  %1015 = vmatprep.subr.bf16.mxu0 %v1051_v40 }
 0xa8d   :  { %v993_v8 = vmul.f32 -1.442695, %v647_v2  ;;  %v640_v5 = vpop.f32.mrb[23].mxu1 }
 0xa8f   :  { %1085 = vpow2.f32 %v993_v8 }
 0xa99   :  { %v1086_v1 = vpop.eup %1085 }
 0xa9a   :  { %v651_v12 = vadd.f32 1.0, %v1086_v1 }
 0xa9c   :  { %1087 = vrcp.f32 %v651_v12 }
 0xaa6   :  { %v1088_v16 = vpop.eup %1087 }
 0xaa7   :  { %v655_v6 = vmul.f32 %v1088_v16, %v654_v13 }
 0xaa9   :  { %v656_v9 = vadd.f32 %v655_v6, %v646_v18  ;;  %v794_v18 = vld [vmem:[#allocation3 + $0x78] sm:$0xff] }
 0xaab   :  { %1089 = vtanh.f32 %v656_v9 }
 0xab5   :  { %v1090_v19 = vpop.eup %1089 }
 0xab6   :  { %v658_v20 = vsub.f32 %v594_v61, %v1090_v19 }
 0xab8   :  { %660 = vrot.lane.b32.xlu0 %v658_v20, %s1105_s1 }
 0xb2a   :  { %v661_v10 = vpop.permute.xlu0 %660 }
 0xb2b   :  { %v663_v11 = vmul.f32 %v1088_v16, %v661_v10 }
 0xb2d   :  { %665 = vrot.lane.b32.xlu1 %v663_v11, %s1105_s1 }
 0xb9f   :  { %v666_v14 = vpop.permute.xlu1 %665 }
 0xba0   :  { %v668_v15 = vadd.f32 %v1090_v19, %v666_v14 }
 0xba2   :  { %670 = vst.msk [vmem:[#allocation4 + $0x28] sm:$0xff] %vm31_vm0, %v668_v15  ;;  %v671_v21 = vpack.c.bf16 %v668_v15, %v668_v15 }
 0xba4   :  { %994 = vmatmul.mubr.msk.bf16.vlgmr.msra.gmra.mrb[16].mxu0 %vm31_vm0, %v671_v21 }
 0xba5   :  { %1016 = vmatpush3.bf16.msra.mxu0 %v1051_v40  ;;  %1023 = vmatprep.mubr.msk.bf16.mxu0 %vm31_vm0, %v828_v24 }
 0xba6   :  { %1017 = vmatprep.subr.bf16.mxu0 %v1052_v23 }
 0xba9   :  { %1018 = vmatpush3.bf16.msra.mxu0 %v1052_v23  ;;  %v825_v30 = vld [vmem:[#allocation4 + $0x28] sm:$0xff] }
 0xbaa   :  { %1019 = vmatprep.subr.bf16.mxu0 %v1053_v25  ;;  %v830_v35 = vpack.c.bf16 %v825_v30, %v824_v34 }
 0xbad   :  { %1020 = vmatpush3.bf16.msra.mxu0 %v1053_v25 }
 0xbae   :  { %1021 = vmatprep.subr.bf16.mxu0 %v1054_v26 }
 0xbb1   :  { %1022 = vmatpush3.bf16.msra.mxu0 %v1054_v26 }
 0xbb4   :  { %1024 = vmatmul.mubr.msk.bf16.vlgmr.msra.gmra.mrb[20].mxu0 %vm31_vm0, %v829_v33 }
 0xbb5   :  { %1027 = vmatprep.mubr.msk.bf16.mxu0 %vm31_vm0, %v830_v35 }
 0xc77   :  { %v709_v36 = vpop.f32.mrb[16].mxu0 }
 0xc78   :  { %v721_v37 = vadd.f32 %v709_v36, %v1275_v47  ;;  %v711_v38 = vpop.f32.mrb[17].mxu0 }
 0xc79   :  { %v713_v7 = vpop.f32.mrb[18].mxu0  ;;  %v728_v54 = vadd.f32 %v1287_v62, %v711_v38 }
 0xc7a   :  { %v995_v39 = vmul.f32 -1.442695, %v721_v37  ;;  %v714_v41 = vpop.f32.mrb[19].mxu0 }
 0xc7c   :  { %1091 = vpow2.f32 %v995_v39 }
 0xc86   :  { %v1092_v43 = vpop.eup %1091 }
 0xc87   :  { %v725_v44 = vadd.f32 1.0, %v1092_v43  ;;  %v1025_v45 = vpop.f32.mrb[20].mxu0 }
 0xc88   :  { %v926_v46 = vadd.f32 %v1025_v45, %v1398_v42  ;;  %v917_v48 = vpop.f32.mrb[21].mxu0 }
 0xc89   :  { %1093 = vrcp.f32 %v725_v44  ;;  %v918_v49 = vadd.f32 %v1398_v42, %v917_v48  ;;  %v1026_v47 = vpop.f32.mrb[22].mxu0 }
 0xc8a   :  { %950 = vst [vmem:[%s1451_s7 + $0x10] sm:$0xff] %v926_v46  ;;  %v929_v50 = vadd.f32 %v1026_v47, %v1398_v42  ;;  %v920_v52 = vpop.f32.mrb[23].mxu0 }
 0xc8b   :  { %948 = vst [vmem:[%s1451_s7] sm:$0xff] %v918_v49  ;;  %v921_v53 = vadd.f32 %v1398_v42, %v920_v52 }
 0xc8c   :  { %951 = vst [vmem:[%s1451_s7 + $0x18] sm:$0xff] %v929_v50 }
 0xc8d   :  { %949 = vst [vmem:[%s1451_s7 + $0x8] sm:$0xff] %v921_v53 }
 0xc93   :  { %v1094_v55 = vpop.eup %1093 }
 0xc94   :  { %v729_v56 = vmul.f32 %v1094_v55, %v728_v54 }
 0xc96   :  { %v730_v29 = vadd.f32 %v729_v56, %v720_v28 }
 0xc98   :  { %1095 = vtanh.f32 %v730_v29 }
 0xca2   :  { %v1096_v57 = vpop.eup %1095 }
 0xca3   :  { %v732_v58 = vsub.f32 %v668_v15, %v1096_v57 }
 0xca5   :  { %734 = vrot.lane.b32.xlu0 %v732_v58, %s1105_s1 }
 0xd17   :  { %v735_v32 = vpop.permute.xlu0 %734 }
 0xd18   :  { %v737_v59 = vmul.f32 %v1094_v55, %v735_v32 }
 0xd1a   :  { %739 = vrot.lane.b32.xlu1 %v737_v59, %s1105_s1 }
 0xd8c   :  { %v740_v60 = vpop.permute.xlu1 %739 }
 0xd8d   :  { %v742_v61 = vadd.f32 %v1096_v57, %v740_v60 }
 0xd8f   :  { %744 = vst.msk [vmem:[#allocation4 + $0x30] sm:$0xff] %vm31_vm0, %v742_v61  ;;  %v745_v63 = vpack.c.bf16 %v742_v61, %v742_v61 }
 0xd91   :  { %996 = vmatmul.mubr.msk.bf16.vlgmr.msra.gmra.mrb[24].mxu1 %vm31_vm0, %v745_v63 }
 0xe64   :  { %v783_v0 = vpop.f32.mrb[24].mxu1 }
 0xe65   :  { %v795_v2 = vadd.f32 %v783_v0, %v1279_v51  ;;  %v785_v3 = vpop.f32.mrb[25].mxu1 }
 0xe66   :  { %v787_v4 = vpop.f32.mrb[26].mxu1  ;;  %v802_v13 = vadd.f32 %v1287_v62, %v785_v3  ;;  %v826_v62 = vld [vmem:[#allocation4 + $0x30] sm:$0xff] }
 0xe67   :  { %v997_v8 = vmul.f32 -1.442695, %v795_v2  ;;  %v788_v5 = vpop.f32.mrb[27].mxu1 }
 0xe69   :  { %1097 = vpow2.f32 %v997_v8 }
 0xe73   :  { %v1098_v1 = vpop.eup %1097 }
 0xe74   :  { %v799_v12 = vadd.f32 1.0, %v1098_v1 }
 0xe76   :  { %1099 = vrcp.f32 %v799_v12 }
 0xe80   :  { %v1100_v16 = vpop.eup %1099 }
 0xe81   :  { %v803_v6 = vmul.f32 %v1100_v16, %v802_v13 }
 0xe83   :  { %v804_v9 = vadd.f32 %v803_v6, %v794_v18 }
 0xe85   :  { %1101 = vtanh.f32 %v804_v9 }
 0xe8f   :  { %v1102_v19 = vpop.eup %1101 }
 0xe90   :  { %v806_v20 = vsub.f32 %v742_v61, %v1102_v19 }
 0xe92   :  { %808 = vrot.lane.b32.xlu0 %v806_v20, %s1105_s1 }
 0xf04   :  { %v809_v51 = vpop.permute.xlu0 %808 }
 0xf05   :  { %v811_v40 = vmul.f32 %v1100_v16, %v809_v51 }
 0xf07   :  { %813 = vrot.lane.b32.xlu1 %v811_v40, %s1105_s1 }
 0xf79   :  { %v814_v10 = vpop.permute.xlu1 %813 }
 0xf7a   :  { %v816_v11 = vadd.f32 %v1102_v19, %v814_v10 }
 0xf7c   :  { %818 = vst.msk [vmem:[#allocation4 + $0x38] sm:$0xff] %vm31_vm0, %v816_v11  ;;  %819 = vst.msk [vmem:[#allocation2] sm:$0xff] %vm31_vm0, %v816_v11 }
 0xf83   :  { %v827_v14 = vld [vmem:[#allocation4 + $0x38] sm:$0xff] }
 0xf84   :  { %v831_v15 = vpack.c.bf16 %v827_v14, %v826_v62 }
 0xf86   :  { %1028 = vmatmul.mubr.msk.bf16.gmra.mrb[24].mxu0 %vm31_vm0, %v831_v15 }
0x1059   :  { %v1029_v17 = vpop.f32.mrb[24].mxu0 }
0x105a   :  { %v942_v21 = vadd.f32 %v1029_v17, %v1398_v42  ;;  %v933_v22 = vpop.f32.mrb[25].mxu0 }
0x105b   :  { %v934_v23 = vadd.f32 %v1398_v42, %v933_v22  ;;  %v1030_v24 = vpop.f32.mrb[26].mxu0 }
0x105c   :  { %954 = vst [vmem:[%s1451_s7 + $0x30] sm:$0xff] %v942_v21  ;;  %v945_v25 = vadd.f32 %v1030_v24, %v1398_v42  ;;  %v936_v26 = vpop.f32.mrb[27].mxu0 }
0x105d   :  { %952 = vst [vmem:[%s1451_s7 + $0x20] sm:$0xff] %v934_v23  ;;  %v937_v27 = vadd.f32 %v1398_v42, %v936_v26 }
0x105e   :  { %955 = vst [vmem:[%s1451_s7 + $0x38] sm:$0xff] %v945_v25 }
0x105f   :  { %953 = vst [vmem:[%s1451_s7 + $0x28] sm:$0xff] %v937_v27 }

</bundles_post_ra>
